<compile_context>
chip_gen: v7x
topology: tpu7x:2x2x1
jax: 0.10.0
libtpu: 0.0.40
codegen_flags: <defaults>
</compile_context>

<pallas_src>
import functools

import jax
import jax.numpy as jnp
from jax.experimental import pallas as pl
from jax.experimental.pallas import tpu as pltpu


def _mca_kernel(x_ref, w1_ref, w2_ref, expand_ref, o_ref, *, n, l):
    """One batch tile of MultiChannelAttention.

    x_ref     : (bt, f, n*l)  lane-dense input tile
    w1_ref    : (fh, f)       Conv2d(f, f//2, 1, bias=False).weight squeezed
    w2_ref    : (f, fh)       Conv2d(f//2, f, 1, bias=False).weight squeezed
    expand_ref: (n, n*l)      block-ones matrix; row c is 1 on lanes [c*l,(c+1)*l)
    o_ref     : (bt, f, n*l)  lane-dense output tile
    """
    x = x_ref[...].astype(jnp.float32)                  # (bt, f, n*l)
    bt = x.shape[0]

    # --- Adaptive avg / max pool over the sequence axis (H == cha_num) ------
    # Each EEG channel occupies a contiguous group of l lanes; reduce per group
    # with static lane slices (n is small), keeping the big tensor un-reshaped.
    sum_cols, max_cols = [], []
    for c in range(n):
        g = x[:, :, c * l:(c + 1) * l]                  # (bt, f, l)
        sum_cols.append(jnp.sum(g, axis=-1, keepdims=True))
        max_cols.append(jnp.max(g, axis=-1, keepdims=True))
    avg_p = jnp.concatenate(sum_cols, axis=-1) * (1.0 / float(l))   # (bt, f, n)
    max_p = jnp.concatenate(max_cols, axis=-1)                      # (bt, f, n)

    # --- Shared fc (1x1 conv -> ReLU -> 1x1 conv), avg & max fused ----------
    p = jnp.concatenate([avg_p, max_p], axis=-1)        # (bt, f, 2n)
    w1 = jnp.broadcast_to(w1_ref[...].astype(jnp.float32),
                          (bt,) + tuple(w1_ref.shape))  # (bt, fh, f)
    w2 = jnp.broadcast_to(w2_ref[...].astype(jnp.float32),
                          (bt,) + tuple(w2_ref.shape))  # (bt, f, fh)
    h = jnp.einsum('bhf,bfc->bhc', w1, p,
                   preferred_element_type=jnp.float32)  # (bt, fh, 2n)
    h = jnp.maximum(h, 0.0)                             # ReLU
    fc_out = jnp.einsum('bfh,bhc->bfc', w2, h,
                        preferred_element_type=jnp.float32)  # (bt, f, 2n)

    scale = jax.nn.sigmoid(fc_out[:, :, :n] + fc_out[:, :, n:])   # (bt, f, n)
    scale_mean = jnp.mean(scale, axis=1)                          # (bt, n)

    # --- Expand per-channel scale across its l lanes with one MXU matmul ----
    scale_rep = jnp.dot(scale_mean, expand_ref[...].astype(jnp.float32),
                        preferred_element_type=jnp.float32)       # (bt, n*l)

    # Single dense broadcast-multiply + single dense store.
    o_ref[...] = (x * scale_rep[:, None, :]).astype(o_ref.dtype)


def _pick_block_b(b, f, nl, itemsize, budget_bytes=8 * 1024 * 1024):
    """Largest divisor of b whose double-buffered in+out tiles fit the budget.

    Budget is conservative: 2 (double buffer) x 2 (in + out) tiles plus the
    f32 working copies stay far below v7x's 64 MiB VMEM / 32 MiB scoped
    default and v5e's 16 MiB scoped default (we also raise vmem_limit_bytes).
    """
    per_batch = f * nl * max(itemsize, 4)   # f32 working copy dominates
    max_bb = max(1, budget_bytes // (4 * per_batch))
    best = 1
    for cand in range(1, b + 1):
        if b % cand == 0 and cand <= max_bb:
            best = cand
    return best


def multi_channel_attention(x, w1, w2, *, block_b=None):
    """x: (b, f, n, l); w1: (f//2, f); w2: (f, f//2). Returns (b, f, n, l)."""
    b, f, n, l = x.shape
    fh = w1.shape[0]
    assert w1.shape == (fh, f), w1.shape
    assert w2.shape == (f, fh), w2.shape
    nl = n * l

    # Lane-dense layout for the kernel: (b, f, n*l). Free reshape in XLA.
    x_flat = x.reshape(b, f, nl)
    # Block-ones expand matrix: row c has 1 on lanes [c*l, (c+1)*l).
    expand = jnp.repeat(jnp.eye(n, dtype=jnp.float32), l, axis=1)   # (n, n*l)

    if block_b is None:
        block_b = _pick_block_b(b, f, nl, x.dtype.itemsize)
    assert b % block_b == 0
    grid = (b // block_b,)

    kernel = functools.partial(_mca_kernel, n=n, l=l)

    out_flat = pl.pallas_call(
        kernel,
        out_shape=jax.ShapeDtypeStruct((b, f, nl), x.dtype),
        grid_spec=pltpu.PrefetchScalarGridSpec(
            num_scalar_prefetch=0,
            grid=grid,
            in_specs=[
                pl.BlockSpec((block_b, f, nl), lambda i: (i, 0, 0)),
                pl.BlockSpec((fh, f), lambda i: (0, 0)),
                pl.BlockSpec((f, fh), lambda i: (0, 0)),
                pl.BlockSpec((n, nl), lambda i: (0, 0)),
            ],
            out_specs=pl.BlockSpec((block_b, f, nl), lambda i: (i, 0, 0)),
        ),
        compiler_params=pltpu.CompilerParams(
            dimension_semantics=("parallel",),
            vmem_limit_bytes=48 * 1024 * 1024,
        ),
    )(x_flat, w1, w2, expand)

    return out_flat.reshape(b, f, n, l)


def _reference(x, w1, w2):
    # Pure-JAX reference mirroring the PyTorch forward (assuming n == cha_num).
    avg_pooled = jnp.mean(x, axis=-1)                         # (b, f, n)
    max_pooled = jnp.max(x, axis=-1)                          # (b, f, n)

    def fc(p):
        h = jnp.einsum("hf,bfn->bhn", w1, p)
        h = jnp.maximum(h, 0.0)
        return jnp.einsum("fh,bhn->bfn", w2, h)

    scale = jax.nn.sigmoid(fc(avg_pooled) + fc(max_pooled))   # (b, f, n)
    scale = jnp.mean(scale, axis=1, keepdims=True)            # (b, 1, n)
    return x * scale[..., None]                               # (b, f, n, l)


if __name__ == "__main__":
    # Small shapes consistent with the module: in_features=8, cha_num=16, seq=32.
    b, f, n, l = 2, 8, 16, 32
    fh = f // 2

    key = jax.random.PRNGKey(0)
    kx, k1, k2 = jax.random.split(key, 3)
    x = jax.random.normal(kx, (b, f, n, l), dtype=jnp.float32)
    # Conv2d(f, f//2, 1, bias=False) weight: (fh, f, 1, 1) -> (fh, f)
    w1 = 0.1 * jax.random.normal(k1, (fh, f), dtype=jnp.float32)
    # Conv2d(f//2, f, 1, bias=False) weight: (f, fh, 1, 1) -> (f, fh)
    w2 = 0.1 * jax.random.normal(k2, (f, fh), dtype=jnp.float32)

    out = jax.block_until_ready(multi_channel_attention(x, w1, w2))
    ref = _reference(x, w1, w2)

    assert out.shape == (b, f, n, l)
    assert jnp.allclose(out, ref, atol=1e-5, rtol=1e-5), "mismatch vs reference"

    print("KERNEL_OK")
</pallas_src>

<mosaic_0001>
module attributes {stable_mosaic.version = 11 : i64} {
  func.func @_mca_kernel(%arg0: i32, %arg1: memref<2x8x512xf32, #tpu.memory_space<vmem>>, %arg2: memref<4x8xf32, #tpu.memory_space<vmem>>, %arg3: memref<8x4xf32, #tpu.memory_space<vmem>>, %arg4: memref<16x512xf32, #tpu.memory_space<vmem>>, %arg5: memref<2x8x512xf32, #tpu.memory_space<vmem>>) attributes {dimension_semantics = [#tpu.dimension_semantics<parallel>], iteration_bounds = array<i64: 1>, scalar_prefetch = 0 : i64, scratch_operands = 0 : i64, tpu.core_type = #tpu.core_type<tc>, window_params = [{transform_indices = @transform_0, window_bounds = array<i64: 2, 8, 512>}, {pipeline_mode = #tpu.pipeline_mode<synchronous>, transform_indices = @transform_1, window_bounds = array<i64: 4, 8>}, {pipeline_mode = #tpu.pipeline_mode<synchronous>, transform_indices = @transform_2, window_bounds = array<i64: 8, 4>}, {pipeline_mode = #tpu.pipeline_mode<synchronous>, transform_indices = @transform_3, window_bounds = array<i64: 16, 512>}, {transform_indices = @transform_4, window_bounds = array<i64: 2, 8, 512>}]} {
    %c0 = arith.constant 0 : index
    %c0_0 = arith.constant 0 : index
    %c0_1 = arith.constant 0 : index
    %0 = vector.load %arg1[%c0, %c0_0, %c0_1] : memref<2x8x512xf32, #tpu.memory_space<vmem>>, vector<2x8x512xf32>
    %1 = vector.extract_strided_slice %0 {offsets = [0, 0, 0], sizes = [2, 8, 32], strides = [1, 1, 1]} : vector<2x8x512xf32> to vector<2x8x32xf32>
    %cst = arith.constant dense<0.000000e+00> : vector<2x8xf32>
    %2 = vector.multi_reduction <add>, %1, %cst [2] : vector<2x8x32xf32> to vector<2x8xf32>
    %3 = vector.shape_cast %2 : vector<2x8xf32> to vector<2x8x1xf32>
    %cst_2 = arith.constant dense<0xFF800000> : vector<2x8xf32>
    %4 = vector.multi_reduction <maximumf>, %1, %cst_2 [2] : vector<2x8x32xf32> to vector<2x8xf32>
    %5 = vector.shape_cast %4 : vector<2x8xf32> to vector<2x8x1xf32>
    %6 = vector.extract_strided_slice %0 {offsets = [0, 0, 32], sizes = [2, 8, 32], strides = [1, 1, 1]} : vector<2x8x512xf32> to vector<2x8x32xf32>
    %cst_3 = arith.constant dense<0.000000e+00> : vector<2x8xf32>
    %7 = vector.multi_reduction <add>, %6, %cst_3 [2] : vector<2x8x32xf32> to vector<2x8xf32>
    %8 = vector.shape_cast %7 : vector<2x8xf32> to vector<2x8x1xf32>
    %cst_4 = arith.constant dense<0xFF800000> : vector<2x8xf32>
    %9 = vector.multi_reduction <maximumf>, %6, %cst_4 [2] : vector<2x8x32xf32> to vector<2x8xf32>
    %10 = vector.shape_cast %9 : vector<2x8xf32> to vector<2x8x1xf32>
    %11 = vector.extract_strided_slice %0 {offsets = [0, 0, 64], sizes = [2, 8, 32], strides = [1, 1, 1]} : vector<2x8x512xf32> to vector<2x8x32xf32>
    %cst_5 = arith.constant dense<0.000000e+00> : vector<2x8xf32>
    %12 = vector.multi_reduction <add>, %11, %cst_5 [2] : vector<2x8x32xf32> to vector<2x8xf32>
    %13 = vector.shape_cast %12 : vector<2x8xf32> to vector<2x8x1xf32>
    %cst_6 = arith.constant dense<0xFF800000> : vector<2x8xf32>
    %14 = vector.multi_reduction <maximumf>, %11, %cst_6 [2] : vector<2x8x32xf32> to vector<2x8xf32>
    %15 = vector.shape_cast %14 : vector<2x8xf32> to vector<2x8x1xf32>
    %16 = vector.extract_strided_slice %0 {offsets = [0, 0, 96], sizes = [2, 8, 32], strides = [1, 1, 1]} : vector<2x8x512xf32> to vector<2x8x32xf32>
    %cst_7 = arith.constant dense<0.000000e+00> : vector<2x8xf32>
    %17 = vector.multi_reduction <add>, %16, %cst_7 [2] : vector<2x8x32xf32> to vector<2x8xf32>
    %18 = vector.shape_cast %17 : vector<2x8xf32> to vector<2x8x1xf32>
    %cst_8 = arith.constant dense<0xFF800000> : vector<2x8xf32>
    %19 = vector.multi_reduction <maximumf>, %16, %cst_8 [2] : vector<2x8x32xf32> to vector<2x8xf32>
    %20 = vector.shape_cast %19 : vector<2x8xf32> to vector<2x8x1xf32>
    %21 = vector.extract_strided_slice %0 {offsets = [0, 0, 128], sizes = [2, 8, 32], strides = [1, 1, 1]} : vector<2x8x512xf32> to vector<2x8x32xf32>
    %cst_9 = arith.constant dense<0.000000e+00> : vector<2x8xf32>
    %22 = vector.multi_reduction <add>, %21, %cst_9 [2] : vector<2x8x32xf32> to vector<2x8xf32>
    %23 = vector.shape_cast %22 : vector<2x8xf32> to vector<2x8x1xf32>
    %cst_10 = arith.constant dense<0xFF800000> : vector<2x8xf32>
    %24 = vector.multi_reduction <maximumf>, %21, %cst_10 [2] : vector<2x8x32xf32> to vector<2x8xf32>
    %25 = vector.shape_cast %24 : vector<2x8xf32> to vector<2x8x1xf32>
    %26 = vector.extract_strided_slice %0 {offsets = [0, 0, 160], sizes = [2, 8, 32], strides = [1, 1, 1]} : vector<2x8x512xf32> to vector<2x8x32xf32>
    %cst_11 = arith.constant dense<0.000000e+00> : vector<2x8xf32>
    %27 = vector.multi_reduction <add>, %26, %cst_11 [2] : vector<2x8x32xf32> to vector<2x8xf32>
    %28 = vector.shape_cast %27 : vector<2x8xf32> to vector<2x8x1xf32>
    %cst_12 = arith.constant dense<0xFF800000> : vector<2x8xf32>
    %29 = vector.multi_reduction <maximumf>, %26, %cst_12 [2] : vector<2x8x32xf32> to vector<2x8xf32>
    %30 = vector.shape_cast %29 : vector<2x8xf32> to vector<2x8x1xf32>
    %31 = vector.extract_strided_slice %0 {offsets = [0, 0, 192], sizes = [2, 8, 32], strides = [1, 1, 1]} : vector<2x8x512xf32> to vector<2x8x32xf32>
    %cst_13 = arith.constant dense<0.000000e+00> : vector<2x8xf32>
    %32 = vector.multi_reduction <add>, %31, %cst_13 [2] : vector<2x8x32xf32> to vector<2x8xf32>
    %33 = vector.shape_cast %32 : vector<2x8xf32> to vector<2x8x1xf32>
    %cst_14 = arith.constant dense<0xFF800000> : vector<2x8xf32>
    %34 = vector.multi_reduction <maximumf>, %31, %cst_14 [2] : vector<2x8x32xf32> to vector<2x8xf32>
    %35 = vector.shape_cast %34 : vector<2x8xf32> to vector<2x8x1xf32>
    %36 = vector.extract_strided_slice %0 {offsets = [0, 0, 224], sizes = [2, 8, 32], strides = [1, 1, 1]} : vector<2x8x512xf32> to vector<2x8x32xf32>
    %cst_15 = arith.constant dense<0.000000e+00> : vector<2x8xf32>
    %37 = vector.multi_reduction <add>, %36, %cst_15 [2] : vector<2x8x32xf32> to vector<2x8xf32>
    %38 = vector.shape_cast %37 : vector<2x8xf32> to vector<2x8x1xf32>
    %cst_16 = arith.constant dense<0xFF800000> : vector<2x8xf32>
    %39 = vector.multi_reduction <maximumf>, %36, %cst_16 [2] : vector<2x8x32xf32> to vector<2x8xf32>
    %40 = vector.shape_cast %39 : vector<2x8xf32> to vector<2x8x1xf32>
    %41 = vector.extract_strided_slice %0 {offsets = [0, 0, 256], sizes = [2, 8, 32], strides = [1, 1, 1]} : vector<2x8x512xf32> to vector<2x8x32xf32>
    %cst_17 = arith.constant dense<0.000000e+00> : vector<2x8xf32>
    %42 = vector.multi_reduction <add>, %41, %cst_17 [2] : vector<2x8x32xf32> to vector<2x8xf32>
    %43 = vector.shape_cast %42 : vector<2x8xf32> to vector<2x8x1xf32>
    %cst_18 = arith.constant dense<0xFF800000> : vector<2x8xf32>
    %44 = vector.multi_reduction <maximumf>, %41, %cst_18 [2] : vector<2x8x32xf32> to vector<2x8xf32>
    %45 = vector.shape_cast %44 : vector<2x8xf32> to vector<2x8x1xf32>
    %46 = vector.extract_strided_slice %0 {offsets = [0, 0, 288], sizes = [2, 8, 32], strides = [1, 1, 1]} : vector<2x8x512xf32> to vector<2x8x32xf32>
    %cst_19 = arith.constant dense<0.000000e+00> : vector<2x8xf32>
    %47 = vector.multi_reduction <add>, %46, %cst_19 [2] : vector<2x8x32xf32> to vector<2x8xf32>
    %48 = vector.shape_cast %47 : vector<2x8xf32> to vector<2x8x1xf32>
    %cst_20 = arith.constant dense<0xFF800000> : vector<2x8xf32>
    %49 = vector.multi_reduction <maximumf>, %46, %cst_20 [2] : vector<2x8x32xf32> to vector<2x8xf32>
    %50 = vector.shape_cast %49 : vector<2x8xf32> to vector<2x8x1xf32>
    %51 = vector.extract_strided_slice %0 {offsets = [0, 0, 320], sizes = [2, 8, 32], strides = [1, 1, 1]} : vector<2x8x512xf32> to vector<2x8x32xf32>
    %cst_21 = arith.constant dense<0.000000e+00> : vector<2x8xf32>
    %52 = vector.multi_reduction <add>, %51, %cst_21 [2] : vector<2x8x32xf32> to vector<2x8xf32>
    %53 = vector.shape_cast %52 : vector<2x8xf32> to vector<2x8x1xf32>
    %cst_22 = arith.constant dense<0xFF800000> : vector<2x8xf32>
    %54 = vector.multi_reduction <maximumf>, %51, %cst_22 [2] : vector<2x8x32xf32> to vector<2x8xf32>
    %55 = vector.shape_cast %54 : vector<2x8xf32> to vector<2x8x1xf32>
    %56 = vector.extract_strided_slice %0 {offsets = [0, 0, 352], sizes = [2, 8, 32], strides = [1, 1, 1]} : vector<2x8x512xf32> to vector<2x8x32xf32>
    %cst_23 = arith.constant dense<0.000000e+00> : vector<2x8xf32>
    %57 = vector.multi_reduction <add>, %56, %cst_23 [2] : vector<2x8x32xf32> to vector<2x8xf32>
    %58 = vector.shape_cast %57 : vector<2x8xf32> to vector<2x8x1xf32>
    %cst_24 = arith.constant dense<0xFF800000> : vector<2x8xf32>
    %59 = vector.multi_reduction <maximumf>, %56, %cst_24 [2] : vector<2x8x32xf32> to vector<2x8xf32>
    %60 = vector.shape_cast %59 : vector<2x8xf32> to vector<2x8x1xf32>
    %61 = vector.extract_strided_slice %0 {offsets = [0, 0, 384], sizes = [2, 8, 32], strides = [1, 1, 1]} : vector<2x8x512xf32> to vector<2x8x32xf32>
    %cst_25 = arith.constant dense<0.000000e+00> : vector<2x8xf32>
    %62 = vector.multi_reduction <add>, %61, %cst_25 [2] : vector<2x8x32xf32> to vector<2x8xf32>
    %63 = vector.shape_cast %62 : vector<2x8xf32> to vector<2x8x1xf32>
    %cst_26 = arith.constant dense<0xFF800000> : vector<2x8xf32>
    %64 = vector.multi_reduction <maximumf>, %61, %cst_26 [2] : vector<2x8x32xf32> to vector<2x8xf32>
    %65 = vector.shape_cast %64 : vector<2x8xf32> to vector<2x8x1xf32>
    %66 = vector.extract_strided_slice %0 {offsets = [0, 0, 416], sizes = [2, 8, 32], strides = [1, 1, 1]} : vector<2x8x512xf32> to vector<2x8x32xf32>
    %cst_27 = arith.constant dense<0.000000e+00> : vector<2x8xf32>
    %67 = vector.multi_reduction <add>, %66, %cst_27 [2] : vector<2x8x32xf32> to vector<2x8xf32>
    %68 = vector.shape_cast %67 : vector<2x8xf32> to vector<2x8x1xf32>
    %cst_28 = arith.constant dense<0xFF800000> : vector<2x8xf32>
    %69 = vector.multi_reduction <maximumf>, %66, %cst_28 [2] : vector<2x8x32xf32> to vector<2x8xf32>
    %70 = vector.shape_cast %69 : vector<2x8xf32> to vector<2x8x1xf32>
    %71 = vector.extract_strided_slice %0 {offsets = [0, 0, 448], sizes = [2, 8, 32], strides = [1, 1, 1]} : vector<2x8x512xf32> to vector<2x8x32xf32>
    %cst_29 = arith.constant dense<0.000000e+00> : vector<2x8xf32>
    %72 = vector.multi_reduction <add>, %71, %cst_29 [2] : vector<2x8x32xf32> to vector<2x8xf32>
    %73 = vector.shape_cast %72 : vector<2x8xf32> to vector<2x8x1xf32>
    %cst_30 = arith.constant dense<0xFF800000> : vector<2x8xf32>
    %74 = vector.multi_reduction <maximumf>, %71, %cst_30 [2] : vector<2x8x32xf32> to vector<2x8xf32>
    %75 = vector.shape_cast %74 : vector<2x8xf32> to vector<2x8x1xf32>
    %76 = vector.extract_strided_slice %0 {offsets = [0, 0, 480], sizes = [2, 8, 32], strides = [1, 1, 1]} : vector<2x8x512xf32> to vector<2x8x32xf32>
    %cst_31 = arith.constant dense<0.000000e+00> : vector<2x8xf32>
    %77 = vector.multi_reduction <add>, %76, %cst_31 [2] : vector<2x8x32xf32> to vector<2x8xf32>
    %78 = vector.shape_cast %77 : vector<2x8xf32> to vector<2x8x1xf32>
    %cst_32 = arith.constant dense<0xFF800000> : vector<2x8xf32>
    %79 = vector.multi_reduction <maximumf>, %76, %cst_32 [2] : vector<2x8x32xf32> to vector<2x8xf32>
    %80 = vector.shape_cast %79 : vector<2x8xf32> to vector<2x8x1xf32>
    %81 = tpu.concatenate %3, %8, %13, %18, %23, %28, %33, %38, %43, %48, %53, %58, %63, %68, %73, %78 in 2 : vector<2x8x1xf32>, vector<2x8x1xf32>, vector<2x8x1xf32>, vector<2x8x1xf32>, vector<2x8x1xf32>, vector<2x8x1xf32>, vector<2x8x1xf32>, vector<2x8x1xf32>, vector<2x8x1xf32>, vector<2x8x1xf32>, vector<2x8x1xf32>, vector<2x8x1xf32>, vector<2x8x1xf32>, vector<2x8x1xf32>, vector<2x8x1xf32>, vector<2x8x1xf32> -> vector<2x8x16xf32>
    %cst_33 = arith.constant 3.125000e-02 : f32
    %82 = vector.broadcast %cst_33 : f32 to vector<2x8x16xf32>
    %83 = arith.mulf %81, %82 : vector<2x8x16xf32>
    %84 = tpu.concatenate %5, %10, %15, %20, %25, %30, %35, %40, %45, %50, %55, %60, %65, %70, %75, %80 in 2 : vector<2x8x1xf32>, vector<2x8x1xf32>, vector<2x8x1xf32>, vector<2x8x1xf32>, vector<2x8x1xf32>, vector<2x8x1xf32>, vector<2x8x1xf32>, vector<2x8x1xf32>, vector<2x8x1xf32>, vector<2x8x1xf32>, vector<2x8x1xf32>, vector<2x8x1xf32>, vector<2x8x1xf32>, vector<2x8x1xf32>, vector<2x8x1xf32>, vector<2x8x1xf32> -> vector<2x8x16xf32>
    %85 = tpu.concatenate %83, %84 in 2 : vector<2x8x16xf32>, vector<2x8x16xf32> -> vector<2x8x32xf32>
    %c0_34 = arith.constant 0 : index
    %c0_35 = arith.constant 0 : index
    %86 = vector.load %arg2[%c0_34, %c0_35] : memref<4x8xf32, #tpu.memory_space<vmem>>, vector<4x8xf32>
    %87 = vector.shape_cast %86 : vector<4x8xf32> to vector<1x4x8xf32>
    %88 = vector.broadcast %87 : vector<1x4x8xf32> to vector<2x4x8xf32>
    %c0_36 = arith.constant 0 : index
    %c0_37 = arith.constant 0 : index
    %89 = vector.load %arg3[%c0_36, %c0_37] : memref<8x4xf32, #tpu.memory_space<vmem>>, vector<8x4xf32>
    %90 = vector.shape_cast %89 : vector<8x4xf32> to vector<1x8x4xf32>
    %91 = vector.broadcast %90 : vector<1x8x4xf32> to vector<2x8x4xf32>
    "tpu.trace_start"() <{level = 10 : i32, message = "bhf,bfc->bhc"}> : () -> ()
    %cst_38 = arith.constant dense<0.000000e+00> : vector<2x4x32xf32>
    %92 = tpu.matmul %88, %85, %cst_38 {dimension_numbers = #tpu.dot_dimension_numbers<[2], [1], [1], [2], [0, 0, 0, 1, 1, 2], [0], [0]>} : vector<2x4x8xf32>, vector<2x8x32xf32>, vector<2x4x32xf32> -> vector<2x4x32xf32>
    "tpu.trace_stop"() : () -> ()
    %cst_39 = arith.constant 0.000000e+00 : f32
    %93 = vector.broadcast %cst_39 : f32 to vector<2x4x32xf32>
    %94 = arith.maximumf %92, %93 : vector<2x4x32xf32>
    "tpu.trace_start"() <{level = 10 : i32, message = "bfh,bhc->bfc"}> : () -> ()
    %cst_40 = arith.constant dense<0.000000e+00> : vector<2x8x32xf32>
    %95 = tpu.matmul %91, %94, %cst_40 {dimension_numbers = #tpu.dot_dimension_numbers<[2], [1], [1], [2], [0, 0, 0, 1, 1, 2], [0], [0]>} : vector<2x8x4xf32>, vector<2x4x32xf32>, vector<2x8x32xf32> -> vector<2x8x32xf32>
    "tpu.trace_stop"() : () -> ()
    %96 = vector.extract_strided_slice %95 {offsets = [0, 0, 0], sizes = [2, 8, 16], strides = [1, 1, 1]} : vector<2x8x32xf32> to vector<2x8x16xf32>
    %97 = vector.extract_strided_slice %95 {offsets = [0, 0, 16], sizes = [2, 8, 16], strides = [1, 1, 1]} : vector<2x8x32xf32> to vector<2x8x16xf32>
    %98 = arith.addf %96, %97 : vector<2x8x16xf32>
    %99 = arith.negf %98 : vector<2x8x16xf32>
    %100 = math.exp %99 : vector<2x8x16xf32>
    %cst_41 = arith.constant 1.000000e+00 : f32
    %101 = vector.broadcast %cst_41 : f32 to vector<2x8x16xf32>
    %102 = arith.addf %101, %100 : vector<2x8x16xf32>
    %103 = arith.divf %101, %102 : vector<2x8x16xf32>
    %cst_42 = arith.constant dense<0.000000e+00> : vector<2x16xf32>
    %104 = vector.multi_reduction <add>, %103, %cst_42 [1] : vector<2x8x16xf32> to vector<2x16xf32>
    %cst_43 = arith.constant 8.000000e+00 : f32
    %105 = vector.broadcast %cst_43 : f32 to vector<2x16xf32>
    %106 = arith.divf %104, %105 : vector<2x16xf32>
    %c0_44 = arith.constant 0 : index
    %c0_45 = arith.constant 0 : index
    %107 = vector.load %arg4[%c0_44, %c0_45] : memref<16x512xf32, #tpu.memory_space<vmem>>, vector<16x512xf32>
    %cst_46 = arith.constant dense<0.000000e+00> : vector<2x512xf32>
    %108 = tpu.matmul %106, %107, %cst_46 {dimension_numbers = #tpu.dot_dimension_numbers<[1], [0], [0], [1], [0, 0, 1, 1], [], []>} : vector<2x16xf32>, vector<16x512xf32>, vector<2x512xf32> -> vector<2x512xf32>
    %109 = vector.shape_cast %108 : vector<2x512xf32> to vector<2x1x512xf32>
    %110 = vector.broadcast %109 : vector<2x1x512xf32> to vector<2x8x512xf32>
    %111 = arith.mulf %0, %110 : vector<2x8x512xf32>
    %c0_47 = arith.constant 0 : index
    %c0_48 = arith.constant 0 : index
    %c0_49 = arith.constant 0 : index
    %112 = vector.load %arg5[%c0_47, %c0_48, %c0_49] : memref<2x8x512xf32, #tpu.memory_space<vmem>>, vector<2x8x512xf32>
    tpu.vector_store %arg5[%c0_47, %c0_48, %c0_49], %111 {strides = array<i32>} : memref<2x8x512xf32, #tpu.memory_space<vmem>>, vector<2x8x512xf32>,
    return
  }
  func.func @transform_0(%arg0: i32) -> (i32, i32, i32) {
    %c0_i32 = arith.constant 0 : i32
    %c0_i32_0 = arith.constant 0 : i32
    %c0_i32_1 = arith.constant 0 : i32
    return %arg0, %c0_i32, %c0_i32_0 : i32, i32, i32
  }
  func.func @transform_1(%arg0: i32) -> (i32, i32) {
    %c0_i32 = arith.constant 0 : i32
    %c0_i32_0 = arith.constant 0 : i32
    %c0_i32_1 = arith.constant 0 : i32
    return %c0_i32, %c0_i32_0 : i32, i32
  }
  func.func @transform_2(%arg0: i32) -> (i32, i32) {
    %c0_i32 = arith.constant 0 : i32
    %c0_i32_0 = arith.constant 0 : i32
    %c0_i32_1 = arith.constant 0 : i32
    return %c0_i32, %c0_i32_0 : i32, i32
  }
  func.func @transform_3(%arg0: i32) -> (i32, i32) {
    %c0_i32 = arith.constant 0 : i32
    %c0_i32_0 = arith.constant 0 : i32
    %c0_i32_1 = arith.constant 0 : i32
    return %c0_i32, %c0_i32_0 : i32, i32
  }
  func.func @transform_4(%arg0: i32) -> (i32, i32, i32) {
    %c0_i32 = arith.constant 0 : i32
    %c0_i32_0 = arith.constant 0 : i32
    %c0_i32_1 = arith.constant 0 : i32
    return %arg0, %c0_i32, %c0_i32_0 : i32, i32, i32
  }
}

</mosaic_0001>

<bundles_post_ra>
// kernel: tpu_custom_call.1
= control target key start
LH: loop header
LB: loop body
LE: loop exit
PB: predicated region body
PF: predicated region fallthrough
CT: control target
= control target key end

     0   :  { %9 = vsyncpa [#allocation3], 0  ;;  %s1563_s0 = inlined_call_operand.hbm [shape: f32[2,8,512], index: 0, kind: input, shape index: {}]   ;;  %s1564_s1 = inlined_call_operand.vmem [shape: f32[4,8], index: 1, kind: input, shape index: {}]   ;;  %s1565_s2 = inlined_call_operand.vmem [shape: f32[8,4], index: 2, kind: input, shape index: {}]   ;;  %s1566_s3 = inlined_call_operand.hbm [shape: f32[16,512], index: 3, kind: input, shape index: {}]   ;;  %s1567_s4 = inlined_call_operand.hbm [shape: f32[2,8,512], index: 4, kind: output, shape index: {}]  }
   0x1   :  { %10 = vsyncpa [#allocation6], 0 }
   0x2   :  { %11 = vsyncpa [#allocation4], 0  ;;  %s1158_s15 = smov [#allocation2]   ;;  %s1086_s19 = scalar_lea.hbm %s1563_s0, 1024 }
   0x3   :  { %s17_s16 = sshll.u32 %s1158_s15, 4  ;;  %p1087_p0 = scmp.ne.s32.totalorder %s1563_s0, %s1086_s19  ;;  %s18_s16 = int_to_ptr.vmem [resolvable:$true] %s17_s16 }
   0x4   :  { %p1090_p1 = scmp.lt.u32.totalorder %s1086_s19, %s1563_s0 }
   0x6   :  { %p1092_p2 = pnand %p1090_p1, %p1087_p0 }
   0x8   :  { %1095 = shalt.err (!%p1092_p2)
}
   0x9   :  { %s1096_s24 = scalar_lea.vmem %s18_s16, 1024  ;;  %p1101_p4 = scmp.lt.s32.totalorder %s18_s16, %s18_s16 }
   0xa   :  { %p1097_p3 = scmp.ne.s32.totalorder %s18_s16, %s1096_s24  ;;  %p1102_p5 = scmp.lt.s32.totalorder %s1096_s24, %s1096_s24 }
   0xc   :  { %p1103_p6 = por %p1102_p5, %p1101_p4 }
   0xe   :  { %p1104_p7 = pnand %p1103_p6, %p1097_p3 }
  0x10   :  { %1107 = shalt.err (!%p1104_p7)
}
  0x11   :  { %s1159_s25 = smov 512   ;;  %s1160_s26 = smov 32  }
  0x12   :  { %23 = dma.hbm_to_vmem [thread:$0]  %s1563_s0, 1024, %s18_s16, [#allocation3], %s1159_s25, %s1159_s25, %s1160_s26  }
  0x13   :  { %s1161_s29 = smov [#allocation5]   ;;  %s1108_s7 = scalar_lea.hbm %s1566_s3, 1024 }
  0x14   :  { %s33_s30 = sshll.u32 %s1161_s29, 4  ;;  %p1109_p8 = scmp.ne.s32.totalorder %s1566_s3, %s1108_s7  ;;  %s34_s30 = int_to_ptr.vmem [resolvable:$true] %s33_s30 }
  0x15   :  { %p1112_p9 = scmp.lt.u32.totalorder %s1108_s7, %s1566_s3 }
  0x17   :  { %p1114_p10 = pnand %p1112_p9, %p1109_p8 }
  0x19   :  { %1117 = shalt.err (!%p1114_p10)
}
  0x1a   :  { %s1118_s12 = scalar_lea.vmem %s34_s30, 1024  ;;  %p1123_p12 = scmp.lt.s32.totalorder %s34_s30, %s34_s30 }
  0x1b   :  { %p1119_p11 = scmp.ne.s32.totalorder %s34_s30, %s1118_s12  ;;  %p1124_p13 = scmp.lt.s32.totalorder %s1118_s12, %s1118_s12 }
  0x1d   :  { %p1125_p0 = por %p1124_p13, %p1123_p12 }
  0x1f   :  { %p1126_p1 = pnand %p1125_p0, %p1119_p11 }
  0x21   :  { %1129 = shalt.err (!%p1126_p1)
}
  0x22   :  { %39 = dma.hbm_to_vmem [thread:$0]  %s1566_s3, 1024, %s34_s30, [#allocation6], %s1159_s25, %s1159_s25, %s1160_s26  }
  0x23   :  { %1152 = dma.done.wait [#allocation3], 1024  }
  0x24   :  { %1153 = vsyncadd [#allocation3], 4294966272 }
  0x25   :  { %1154 = dma.done.wait [#allocation6], 1024  }
  0x26   :  { %1155 = vsyncadd [#allocation6], 4294966272  ;;  %v1225_v0 = vld [vmem:[#allocation2] sm:$0xff]  ;;  %s1162_s14 = smov 64   ;;  %s1163_s15 = smov 96   ;;  %vm54_vm0 = vcmask 261120  }
  0x27   :  { %88 = vrot.lane.b32.xlu1 %v1225_v0, %s1162_s14  ;;  %69 = vrot.lane.b32.xlu0 %v1225_v0, %s1163_s15  ;;  %v1231_v1 = vld [vmem:[#allocation2 + $0x20] sm:$0xff]  ;;  %v61_v2 = vsel %vm54_vm0, %v1225_v0, -inf  ;;  %vm81_vm1 = vcmask 523520   ;;  %vm100_vm2 = vcmask 785920   ;;  %v1253_v8 = vld [vmem:[#allocation2 + $0x8] sm:$0xff]  ;;  %vm119_vm3 = vcmask 1048320  }
  0x28   :  { %v82_v3 = vsel %vm81_vm1, %v1225_v0, -inf  ;;  %v64_v4 = vsel %vm54_vm0, %v1231_v1, -inf  ;;  %v85_v5 = vsel %vm81_vm1, %v1231_v1, -inf  ;;  %v101_v6 = vsel %vm100_vm2, %v1225_v0, -inf  ;;  %v1257_v9 = vld [vmem:[#allocation2 + $0x28] sm:$0xff]  ;;  %v1301_v34 = vld [vmem:[#allocation2 + $0x10] sm:$0xff] }
  0x29   :  { %v104_v7 = vsel %vm100_vm2, %v1231_v1, -inf  ;;  %v120_v10 = vsel %vm119_vm3, %v1225_v0, -inf  ;;  %v123_v11 = vsel %vm119_vm3, %v1231_v1, -inf  ;;  %v132_v12 = vsel %vm54_vm0, %v1253_v8, -inf  ;;  %v1305_v35 = vld [vmem:[#allocation2 + $0x30] sm:$0xff]  ;;  %s1166_s3 = smov 16  }
  0x2a   :  { %v135_v13 = vsel %vm54_vm0, %v1257_v9, -inf  ;;  %vm330_vm4 = vcmask 7168   ;;  %vm333_vm5 = vcmask 15360   ;;  %v152_v30 = vsel %vm81_vm1, %v1253_v8, -inf  ;;  %s1167_s19 = smov 112  }
  0x2b   :  { %90 = vrot.lane.b32.xlu1 %v1231_v1, %s1162_s14  ;;  %71 = vrot.lane.b32.xlu0 %v1231_v1, %s1163_s15  ;;  %v155_v31 = vsel %vm81_vm1, %v1257_v9, -inf  ;;  %v170_v32 = vsel %vm100_vm2, %v1253_v8, -inf  ;;  %v173_v33 = vsel %vm100_vm2, %v1257_v9, -inf  ;;  %vm336_vm6 = vcmask 23552  }
  0x2c   :  { %v188_v42 = vsel %vm119_vm3, %v1253_v8, -inf  ;;  %v191_v43 = vsel %vm119_vm3, %v1257_v9, -inf  ;;  %vm339_vm7 = vcmask 31744   ;;  %v200_v50 = vsel %vm54_vm0, %v1301_v34, -inf }
  0x2d   :  { %v203_v51 = vsel %vm54_vm0, %v1305_v35, -inf  ;;  %vm342_vm8 = vcmask 39936   ;;  %vm345_vm9 = vcmask 48128   ;;  %v220_v62 = vsel %vm81_vm1, %v1301_v34, -inf }
  0x2e   :  { %v223_v63 = vsel %vm81_vm1, %v1305_v35, -inf  ;;  %vm348_vm10 = vcmask 56320   ;;  %vm351_vm11 = vcmask 64512   ;;  %vm354_vm12 = vcmask 72704  }
  0x2f   :  { %109 = vrot.lane.b32.xlu1 %v1231_v1, %s1160_s26  ;;  %107 = vrot.lane.b32.xlu0 %v1225_v0, %s1160_s26  ;;  %vm357_vm13 = vcmask 80896   ;;  %vm360_vm14 = vcmask 89088   ;;  %vm1165_vm15 = vmmov 0  }
  0x4e   :  { %62 = vmax.xlane.f32.xlu0 %v61_v2  ;;  %v238_v2 = vsel %vm100_vm2, %v1301_v34, -inf }
  0x52   :  { %83 = vmax.xlane.f32.xlu0 %v82_v3  ;;  %v241_v3 = vsel %vm100_vm2, %v1305_v35, -inf }
  0x53   :  { %65 = vmax.xlane.f32.xlu1 %v64_v4  ;;  %v1353_v4 = vld [vmem:[#allocation2 + $0x18] sm:$0xff] }
  0x56   :  { %86 = vmax.xlane.f32.xlu0 %v85_v5  ;;  %v1357_v5 = vld [vmem:[#allocation2 + $0x38] sm:$0xff] }
  0x57   :  { %102 = vmax.xlane.f32.xlu1 %v101_v6 }
  0x5a   :  { %105 = vmax.xlane.f32.xlu0 %v104_v7 }
  0x68   :  { %140 = vrot.lane.b32.xlu1 %v1253_v8, %s1163_s15 }
  0x70   :  { %142 = vrot.lane.b32.xlu0 %v1257_v9, %s1163_s15 }
  0x8c   :  { %121 = vmax.xlane.f32.xlu1 %v120_v10 }
  0x8f   :  { %124 = vmax.xlane.f32.xlu0 %v123_v11 }
  0x99   :  { %v1273_v14 = vpop.permute.xlu0 %69  ;;  %v1275_v15 = vpop.permute.xlu1 %88 }
  0x9d   :  { %158 = vrot.lane.b32.xlu1 %v1253_v8, %s1162_s14  ;;  %v1277_v16 = vpop.permute.xlu0 %71  ;;  %v1281_v17 = vpop.permute.xlu1 %90 }
  0xa1   :  { %v1283_v18 = vpop.permute.xlu0 %107  ;;  %v1287_v20 = vpop.permute.xlu1 %109 }
  0xa5   :  { %160 = vrot.lane.b32.xlu0 %v1257_v9, %s1162_s14 }
  0xc1   :  { %133 = vmax.xlane.f32.xlu1 %v132_v12 }
  0xc4   :  { %136 = vmax.xlane.f32.xlu0 %v135_v13 }
  0xd2   :  { %176 = vrot.lane.b32.xlu1 %v1253_v8, %s1160_s26 }
  0xda   :  { %178 = vrot.lane.b32.xlu0 %v1257_v9, %s1160_s26 }
  0xdb   :  { %v63_v19 = vpop.xlane.xlu0 %62 }
  0xdf   :  { %v84_v21 = vpop.xlane.xlu0 %83 }
  0xe0   :  { %v377_v22 = vsel %vm330_vm4, %v63_v19, %v84_v21  ;;  %v66_v23 = vpop.xlane.xlu1 %65  ;;  %v256_v19 = vsel %vm119_vm3, %v1301_v34, -inf  ;;  %v259_v21 = vsel %vm119_vm3, %v1305_v35, -inf }
  0xe3   :  { %v87_v24 = vpop.xlane.xlu0 %86 }
  0xe4   :  { %v378_v25 = vsel %vm330_vm4, %v66_v23, %v87_v24  ;;  %v103_v26 = vpop.xlane.xlu1 %102 }
  0xe5   :  { %v379_v27 = vsel %vm333_vm5, %v377_v22, %v103_v26 }
  0xe7   :  { %v106_v28 = vpop.xlane.xlu0 %105 }
  0xe8   :  { %v380_v29 = vsel %vm333_vm5, %v378_v25, %v106_v28  ;;  %v1309_v36 = vpop.permute.xlu1 %140  ;;  %v268_v28 = vsel %vm54_vm0, %v1353_v4, -inf }
  0xeb   :  { %v1311_v37 = vpop.permute.xlu0 %142 }
  0xf6   :  { %153 = vmax.xlane.f32.xlu1 %v152_v30 }
  0xf9   :  { %156 = vmax.xlane.f32.xlu0 %v155_v31 }
  0xfa   :  { %171 = vmax.xlane.f32.xlu1 %v170_v32 }
  0xfd   :  { %174 = vmax.xlane.f32.xlu0 %v173_v33 }
 0x10b   :  { %208 = vrot.lane.b32.xlu1 %v1301_v34, %s1163_s15 }
 0x113   :  { %210 = vrot.lane.b32.xlu0 %v1305_v35, %s1163_s15 }
 0x119   :  { %v122_v38 = vpop.xlane.xlu1 %121 }
 0x11a   :  { %v381_v39 = vsel %vm336_vm6, %v379_v27, %v122_v38 }
 0x11c   :  { %v125_v40 = vpop.xlane.xlu0 %124 }
 0x11d   :  { %v382_v41 = vsel %vm336_vm6, %v380_v29, %v125_v40  ;;  %v1323_v44 = vpop.permute.xlu1 %158  ;;  %v271_v29 = vsel %vm54_vm0, %v1357_v5, -inf }
 0x120   :  { %v1325_v45 = vpop.permute.xlu0 %160 }
 0x12f   :  { %189 = vmax.xlane.f32.xlu1 %v188_v42 }
 0x132   :  { %192 = vmax.xlane.f32.xlu0 %v191_v43 }
 0x140   :  { %226 = vrot.lane.b32.xlu1 %v1301_v34, %s1162_s14 }
 0x148   :  { %228 = vrot.lane.b32.xlu0 %v1305_v35, %s1162_s14 }
 0x14e   :  { %v134_v46 = vpop.xlane.xlu1 %133 }
 0x14f   :  { %v383_v47 = vsel %vm339_vm7, %v381_v39, %v134_v46  ;;  %v288_v46 = vsel %vm81_vm1, %v1353_v4, -inf }
 0x151   :  { %v137_v48 = vpop.xlane.xlu0 %136 }
 0x152   :  { %v384_v49 = vsel %vm339_vm7, %v382_v41, %v137_v48  ;;  %v1337_v52 = vpop.permute.xlu1 %176  ;;  %v306_v48 = vsel %vm100_vm2, %v1353_v4, -inf }
 0x155   :  { %v1339_v53 = vpop.permute.xlu0 %178 }
 0x164   :  { %201 = vmax.xlane.f32.xlu1 %v200_v50  ;;  %v324_v50 = vsel %vm119_vm3, %v1353_v4, -inf }
 0x167   :  { %204 = vmax.xlane.f32.xlu0 %v203_v51  ;;  %v327_v51 = vsel %vm119_vm3, %v1357_v5, -inf  ;;  %vm369_vm3 = vcmask 113664  }
 0x175   :  { %244 = vrot.lane.b32.xlu1 %v1301_v34, %s1160_s26 }
 0x17d   :  { %246 = vrot.lane.b32.xlu0 %v1305_v35, %s1160_s26 }
 0x183   :  { %v154_v54 = vpop.xlane.xlu1 %153 }
 0x184   :  { %v385_v55 = vsel %vm342_vm8, %v383_v47, %v154_v54  ;;  %v291_v47 = vsel %vm81_vm1, %v1357_v5, -inf  ;;  %v55_v54 = vsel %vm54_vm0, %v1225_v0, 0.0  ;;  %vm363_vm1 = vcmask 97280  }
 0x186   :  { %v157_v56 = vpop.xlane.xlu0 %156 }
 0x187   :  { %v386_v57 = vsel %vm342_vm8, %v384_v49, %v157_v56  ;;  %v172_v58 = vpop.xlane.xlu1 %171  ;;  %v309_v49 = vsel %vm100_vm2, %v1357_v5, -inf  ;;  %v75_v56 = vsel %vm54_vm0, %v1273_v14, 0.0  ;;  %v126_v14 = vsel %vm54_vm0, %v1253_v8, 0.0 }
 0x188   :  { %v387_v59 = vsel %vm345_vm9, %v385_v55, %v172_v58  ;;  %v58_v55 = vsel %vm54_vm0, %v1231_v1, 0.0  ;;  %v94_v58 = vsel %vm54_vm0, %v1275_v15, 0.0  ;;  %v129_v15 = vsel %vm54_vm0, %v1257_v9, 0.0 }
 0x189   :  { %vm366_vm2 = vcmask 105472  }
 0x18a   :  { %v175_v60 = vpop.xlane.xlu0 %174 }
 0x18b   :  { %v388_v61 = vsel %vm345_vm9, %v386_v57, %v175_v60  ;;  %v1361_v6 = vpop.permute.xlu1 %208  ;;  %v78_v57 = vsel %vm54_vm0, %v1277_v16, 0.0  ;;  %v113_v60 = vsel %vm54_vm0, %v1283_v18, 0.0 }
 0x18e   :  { %v1363_v7 = vpop.permute.xlu0 %210 }
 0x199   :  { %221 = vmax.xlane.f32.xlu1 %v220_v62  ;;  %v149_v62 = vsel %vm54_vm0, %v1311_v37, 0.0  ;;  %v194_v37 = vsel %vm54_vm0, %v1301_v34, 0.0 }
 0x19c   :  { %224 = vmax.xlane.f32.xlu0 %v223_v63 }
 0x19d   :  { %239 = vmax.xlane.f32.xlu1 %v238_v2 }
 0x1a0   :  { %242 = vmax.xlane.f32.xlu0 %v241_v3 }
 0x1ae   :  { %276 = vrot.lane.b32.xlu1 %v1353_v4, %s1163_s15 }
 0x1b6   :  { %278 = vrot.lane.b32.xlu0 %v1357_v5, %s1163_s15 }
 0x1bc   :  { %v190_v10 = vpop.xlane.xlu1 %189 }
 0x1bd   :  { %v389_v11 = vsel %vm348_vm10, %v387_v59, %v190_v10  ;;  %v97_v59 = vsel %vm54_vm0, %v1281_v17, 0.0  ;;  %v146_v17 = vsel %vm54_vm0, %v1309_v36, 0.0  ;;  %v167_v10 = vsel %vm54_vm0, %v1325_v45, 0.0 }
 0x1be   :  { %v214_v45 = vsel %vm54_vm0, %v1361_v6, 0.0  ;;  %v262_v6 = vsel %vm54_vm0, %v1353_v4, 0.0 }
 0x1bf   :  { %v193_v12 = vpop.xlane.xlu0 %192 }
 0x1c0   :  { %v390_v13 = vsel %vm348_vm10, %v388_v61, %v193_v12  ;;  %v1375_v22 = vpop.permute.xlu1 %226  ;;  %v116_v61 = vsel %vm54_vm0, %v1287_v20, 0.0  ;;  %v164_v20 = vsel %vm54_vm0, %v1323_v44, 0.0  ;;  %v185_v44 = vsel %vm54_vm0, %v1339_v53, 0.0 }
 0x1c1   :  { %v197_v12 = vsel %vm54_vm0, %v1305_v35, 0.0 }
 0x1c3   :  { %v1377_v23 = vpop.permute.xlu0 %228 }
 0x1c4   :  { %v235_v53 = vsel %vm54_vm0, %v1377_v23, 0.0 }
 0x1d2   :  { %257 = vmax.xlane.f32.xlu1 %v256_v19 }
 0x1d5   :  { %260 = vmax.xlane.f32.xlu0 %v259_v21 }
 0x1e3   :  { %294 = vrot.lane.b32.xlu1 %v1353_v4, %s1162_s14 }
 0x1eb   :  { %296 = vrot.lane.b32.xlu0 %v1357_v5, %s1162_s14 }
 0x1f1   :  { %v202_v24 = vpop.xlane.xlu1 %201 }
 0x1f2   :  { %v391_v25 = vsel %vm351_vm11, %v389_v11, %v202_v24  ;;  %v182_v11 = vsel %vm54_vm0, %v1337_v52, 0.0  ;;  %v217_v52 = vsel %vm54_vm0, %v1363_v7, 0.0  ;;  %v265_v7 = vsel %vm54_vm0, %v1357_v5, 0.0 }
 0x1f4   :  { %v205_v26 = vpop.xlane.xlu0 %204 }
 0x1f5   :  { %v392_v27 = vsel %vm351_vm11, %v390_v13, %v205_v26  ;;  %v1389_v30 = vpop.permute.xlu1 %244  ;;  %v232_v13 = vsel %vm54_vm0, %v1375_v22, 0.0 }
 0x1f6   :  { %v250_v19 = vsel %vm54_vm0, %v1389_v30, 0.0 }
 0x1f8   :  { %v1391_v31 = vpop.permute.xlu0 %246 }
 0x1f9   :  { %v253_v21 = vsel %vm54_vm0, %v1391_v31, 0.0 }
 0x207   :  { %269 = vmax.xlane.f32.xlu1 %v268_v28 }
 0x20a   :  { %272 = vmax.xlane.f32.xlu0 %v271_v29 }
 0x218   :  { %312 = vrot.lane.b32.xlu1 %v1353_v4, %s1160_s26 }
 0x220   :  { %314 = vrot.lane.b32.xlu0 %v1357_v5, %s1160_s26 }
 0x226   :  { %v222_v32 = vpop.xlane.xlu1 %221 }
 0x227   :  { %v393_v33 = vsel %vm354_vm12, %v391_v25, %v222_v32 }
 0x229   :  { %v225_v38 = vpop.xlane.xlu0 %224 }
 0x22a   :  { %v394_v39 = vsel %vm354_vm12, %v392_v27, %v225_v38  ;;  %v240_v40 = vpop.xlane.xlu1 %239  ;;  %v1164_v38 = vmov 0.0  }
 0x22b   :  { %v395_v41 = vsel %vm357_vm13, %v393_v33, %v240_v40  ;;  %1038 = vmatprep.subr.mxu0 %v1164_v38  ;;  %1043 = vmatprep.subr.mxu1 %v1164_v38 }
 0x22c   :  { %1040 = vmatprep.mubr.msk.f32.mxu0 %vm1165_vm15, %v1164_v38  ;;  %1045 = vmatprep.mubr.msk.f32.mxu1 %vm1165_vm15, %v1164_v38 }
 0x22d   :  { %v243_v42 = vpop.xlane.xlu0 %242 }
 0x22e   :  { %v396_v43 = vsel %vm357_vm13, %v394_v39, %v243_v42  ;;  %v277_v16 = vpop.permute.xlu1 %276 }
 0x22f   :  { %v282_v22 = vsel %vm54_vm0, %v277_v16, 0.0 }
 0x231   :  { %v279_v18 = vpop.permute.xlu0 %278 }
 0x232   :  { %v285_v24 = vsel %vm54_vm0, %v279_v18, 0.0 }
 0x23c   :  { %289 = vmax.xlane.f32.xlu1 %v288_v46 }
 0x23f   :  { %292 = vmax.xlane.f32.xlu0 %v291_v47 }
 0x240   :  { %307 = vmax.xlane.f32.xlu1 %v306_v48 }
 0x243   :  { %310 = vmax.xlane.f32.xlu0 %v309_v49 }
 0x244   :  { %325 = vmax.xlane.f32.xlu1 %v324_v50 }
 0x247   :  { %328 = vmax.xlane.f32.xlu0 %v327_v51 }
 0x248   :  { %56 = vadd.xlane.f32.xlu1 %v55_v54 }
 0x24b   :  { %59 = vadd.xlane.f32.xlu0 %v58_v55 }
 0x24c   :  { %76 = vadd.xlane.f32.xlu1 %v75_v56 }
 0x24f   :  { %79 = vadd.xlane.f32.xlu0 %v78_v57 }
 0x250   :  { %95 = vadd.xlane.f32.xlu1 %v94_v58 }
 0x253   :  { %98 = vadd.xlane.f32.xlu0 %v97_v59 }
 0x254   :  { %114 = vadd.xlane.f32.xlu1 %v113_v60 }
 0x257   :  { %117 = vadd.xlane.f32.xlu0 %v116_v61 }
 0x258   :  { %127 = vadd.xlane.f32.xlu1 %v126_v14 }
 0x25b   :  { %130 = vadd.xlane.f32.xlu0 %v129_v15 }
 0x25c   :  { %147 = vadd.xlane.f32.xlu1 %v146_v17 }
 0x25f   :  { %v258_v63 = vpop.xlane.xlu1 %257  ;;  %150 = vadd.xlane.f32.xlu0 %v149_v62 }
 0x260   :  { %v397_v2 = vsel %vm360_vm14, %v395_v41, %v258_v63  ;;  %165 = vadd.xlane.f32.xlu1 %v164_v20 }
 0x262   :  { %v261_v3 = vpop.xlane.xlu0 %260 }
 0x263   :  { %v1439_v36 = vsel %vm360_vm14, %v396_v43, %v261_v3  ;;  %168 = vadd.xlane.f32.xlu0 %v167_v10  ;;  %v295_v23 = vpop.permute.xlu1 %294 }
 0x264   :  { %183 = vadd.xlane.f32.xlu1 %v182_v11  ;;  %v300_v26 = vsel %vm54_vm0, %v295_v23, 0.0 }
 0x266   :  { %v297_v25 = vpop.permute.xlu0 %296 }
 0x267   :  { %186 = vadd.xlane.f32.xlu0 %v185_v44  ;;  %v303_v27 = vsel %vm54_vm0, %v297_v25, 0.0 }
 0x268   :  { %195 = vadd.xlane.f32.xlu1 %v194_v37 }
 0x26b   :  { %198 = vadd.xlane.f32.xlu0 %v197_v12 }
 0x26c   :  { %215 = vadd.xlane.f32.xlu1 %v214_v45 }
 0x26f   :  { %218 = vadd.xlane.f32.xlu0 %v217_v52 }
 0x270   :  { %233 = vadd.xlane.f32.xlu1 %v232_v13 }
 0x273   :  { %236 = vadd.xlane.f32.xlu0 %v235_v53 }
 0x274   :  { %251 = vadd.xlane.f32.xlu1 %v250_v19 }
 0x277   :  { %254 = vadd.xlane.f32.xlu0 %v253_v21 }
 0x278   :  { %263 = vadd.xlane.f32.xlu1 %v262_v6 }
 0x27b   :  { %266 = vadd.xlane.f32.xlu0 %v265_v7 }
 0x27c   :  { %283 = vadd.xlane.f32.xlu1 %v282_v22 }
 0x27f   :  { %286 = vadd.xlane.f32.xlu0 %v285_v24 }
 0x280   :  { %301 = vadd.xlane.f32.xlu1 %v300_v26 }
 0x283   :  { %304 = vadd.xlane.f32.xlu0 %v303_v27 }
 0x294   :  { %v270_v28 = vpop.xlane.xlu1 %269 }
 0x295   :  { %v399_v42 = vsel %vm363_vm1, %v397_v2, %v270_v28 }
 0x297   :  { %v273_v29 = vpop.xlane.xlu0 %272 }
 0x298   :  { %v313_v30 = vpop.permute.xlu1 %312  ;;  %v400_v49 = vsel %vm363_vm1, %v1439_v36, %v273_v29 }
 0x299   :  { %v318_v31 = vsel %vm54_vm0, %v313_v30, 0.0 }
 0x29a   :  { %319 = vadd.xlane.f32.xlu1 %v318_v31 }
 0x29b   :  { %v315_v32 = vpop.permute.xlu0 %314 }
 0x29c   :  { %v321_v33 = vsel %vm54_vm0, %v315_v32, 0.0  ;;  %vm372_vm0 = vcmask 121856  }
 0x29d   :  { %322 = vadd.xlane.f32.xlu0 %v321_v33 }
 0x2c9   :  { %v290_v39 = vpop.xlane.xlu1 %289 }
 0x2ca   :  { %v401_v43 = vsel %vm366_vm2, %v399_v42, %v290_v39 }
 0x2cc   :  { %v293_v40 = vpop.xlane.xlu0 %292 }
 0x2cd   :  { %v308_v41 = vpop.xlane.xlu1 %307  ;;  %v402_v51 = vsel %vm366_vm2, %v400_v49, %v293_v40 }
 0x2ce   :  { %v403_v47 = vsel %vm369_vm3, %v401_v43, %v308_v41 }
 0x2d0   :  { %v311_v46 = vpop.xlane.xlu0 %310 }
 0x2d1   :  { %v326_v48 = vpop.xlane.xlu1 %325  ;;  %v404_v54 = vsel %vm369_vm3, %v402_v51, %v311_v46 }
 0x2d2   :  { %v405_v50 = vsel %vm372_vm0, %v403_v47, %v326_v48 }
 0x2d3   :  { %409 = vrot.lane.b32.xlu1 %v405_v50, %s1166_s3 }
 0x2d4   :  { %v329_v55 = vpop.xlane.xlu0 %328 }
 0x2d5   :  { %v406_v56 = vsel %vm372_vm0, %v404_v54, %v329_v55  ;;  %v57_v57 = vpop.xlane.xlu1 %56 }
 0x2d6   :  { %411 = vrot.lane.b32.xlu0 %v406_v56, %s1166_s3 }
 0x2d8   :  { %v60_v58 = vpop.xlane.xlu0 %59 }
 0x2d9   :  { %v77_v59 = vpop.xlane.xlu1 %76 }
 0x2da   :  { %v331_v6 = vsel %vm330_vm4, %v57_v57, %v77_v59 }
 0x2dc   :  { %v80_v60 = vpop.xlane.xlu0 %79 }
 0x2dd   :  { %v96_v14 = vpop.xlane.xlu1 %95  ;;  %v332_v23 = vsel %vm330_vm4, %v60_v58, %v80_v60  ;;  %vm415_vm4 = vcmask 130048  }
 0x2de   :  { %v334_v21 = vsel %vm333_vm5, %v331_v6, %v96_v14  ;;  %v759_v6 = vld [vmem:[#allocation5 + $0x28] sm:$0xff] }
 0x2e0   :  { %v99_v61 = vpop.xlane.xlu0 %98 }
 0x2e1   :  { %v115_v15 = vpop.xlane.xlu1 %114  ;;  %v335_v25 = vsel %vm333_vm5, %v332_v23, %v99_v61  ;;  %vm568_vm5 = vcmask 1043456   ;;  %v754_v23 = vld [vmem:[#allocation5] sm:$0xff] }
 0x2e2   :  { %v337_v22 = vsel %vm336_vm6, %v334_v21, %v115_v15  ;;  %v757_v21 = vld [vmem:[#allocation5 + $0x18] sm:$0xff] }
 0x2e4   :  { %v118_v16 = vpop.xlane.xlu0 %117 }
 0x2e5   :  { %v128_v17 = vpop.xlane.xlu1 %127  ;;  %v338_v28 = vsel %vm336_vm6, %v335_v25, %v118_v16  ;;  %vm764_vm6 = vcmask 1041409  }
 0x2e6   :  { %v340_v24 = vsel %vm339_vm7, %v337_v22, %v128_v17  ;;  %v761_v22 = vld [vmem:[#allocation5 + $0x38] sm:$0xff] }
 0x2e7   :  { %v1062_v25 = vpack.c.bf16 %v761_v22, %v757_v21 }
 0x2e8   :  { %v131_v18 = vpop.xlane.xlu0 %130 }
 0x2e9   :  { %v148_v62 = vpop.xlane.xlu1 %147  ;;  %v341_v30 = vsel %vm339_vm7, %v338_v28, %v131_v18  ;;  %v418_v18 = vld [vmem:[%s1564_s1] sm:$0xf]  ;;  %v760_v28 = vld [vmem:[#allocation5 + $0x30] sm:$0xff] }
 0x2ea   :  { %v343_v26 = vsel %vm342_vm8, %v340_v24, %v148_v62  ;;  %v758_v24 = vld [vmem:[#allocation5 + $0x20] sm:$0xff] }
 0x2ec   :  { %v151_v63 = vpop.xlane.xlu0 %150 }
 0x2ed   :  { %v166_v20 = vpop.xlane.xlu1 %165  ;;  %v344_v32 = vsel %vm342_vm8, %v341_v30, %v151_v63 }
 0x2ee   :  { %v346_v29 = vsel %vm345_vm9, %v343_v26, %v166_v20  ;;  %v1060_v26 = vpack.c.bf16 %v758_v24, %v754_v23 }
 0x2f0   :  { %v169_v2 = vpop.xlane.xlu0 %168 }
 0x2f1   :  { %v184_v3 = vpop.xlane.xlu1 %183  ;;  %v347_v40 = vsel %vm345_vm9, %v344_v32, %v169_v2 }
 0x2f2   :  { %v349_v31 = vsel %vm348_vm10, %v346_v29, %v184_v3 }
 0x2f4   :  { %v187_v10 = vpop.xlane.xlu0 %186 }
 0x2f5   :  { %v196_v36 = vpop.xlane.xlu1 %195  ;;  %v350_v42 = vsel %vm348_vm10, %v347_v40, %v187_v10 }
 0x2f6   :  { %v352_v33 = vsel %vm351_vm11, %v349_v31, %v196_v36 }
 0x2f8   :  { %v199_v11 = vpop.xlane.xlu0 %198 }
 0x2f9   :  { %v216_v37 = vpop.xlane.xlu1 %215  ;;  %v353_v46 = vsel %vm351_vm11, %v350_v42, %v199_v11  ;;  %v419_v11 = vld [vmem:[%s1565_s2] sm:$0xff]  ;;  %s1169_s2 = smov [#allocation7]  }
 0x2fa   :  { %v355_v41 = vsel %vm354_vm12, %v352_v33, %v216_v37  ;;  %s1007_s20 = sshll.u32 %s1169_s2, 4  ;;  %s1008_s20 = int_to_ptr.vmem [resolvable:$true] %s1007_s20 }
 0x2fb   :  { %s1130_s21 = scalar_lea.vmem %s1008_s20, 1024  ;;  %p1135_p3 = scmp.lt.s32.totalorder %s1008_s20, %s1008_s20 }
 0x2fc   :  { %v219_v44 = vpop.xlane.xlu0 %218  ;;  %p1131_p2 = scmp.ne.s32.totalorder %s1008_s20, %s1130_s21  ;;  %p1136_p4 = scmp.lt.s32.totalorder %s1130_s21, %s1130_s21 }
 0x2fd   :  { %v234_v12 = vpop.xlane.xlu1 %233  ;;  %v356_v49 = vsel %vm354_vm12, %v353_v46, %v219_v44 }
 0x2fe   :  { %v358_v43 = vsel %vm357_vm13, %v355_v41, %v234_v12  ;;  %p1137_p5 = por %p1136_p4, %p1135_p3 }
 0x300   :  { %v237_v45 = vpop.xlane.xlu0 %236  ;;  %p1138_p6 = pnand %p1137_p5, %p1131_p2 }
 0x301   :  { %v252_v52 = vpop.xlane.xlu1 %251  ;;  %v359_v54 = vsel %vm357_vm13, %v356_v49, %v237_v45 }
 0x302   :  { %v361_v47 = vsel %vm360_vm14, %v358_v43, %v252_v52 }
 0x304   :  { %v255_v13 = vpop.xlane.xlu0 %254 }
 0x305   :  { %v264_v53 = vpop.xlane.xlu1 %263  ;;  %v362_v56 = vsel %vm360_vm14, %v359_v54, %v255_v13 }
 0x306   :  { %v364_v50 = vsel %vm363_vm1, %v361_v47, %v264_v53 }
 0x308   :  { %v267_v19 = vpop.xlane.xlu0 %266 }
 0x309   :  { %v284_v7 = vpop.xlane.xlu1 %283  ;;  %v365_v58 = vsel %vm363_vm1, %v362_v56, %v267_v19  ;;  %v755_v19 = vld [vmem:[#allocation5 + $0x8] sm:$0xff] }
 0x30a   :  { %v367_v55 = vsel %vm366_vm2, %v364_v50, %v284_v7  ;;  %v1058_v7 = vpack.c.bf16 %v759_v6, %v755_v19 }
 0x30c   :  { %v287_v27 = vpop.xlane.xlu0 %286 }
 0x30d   :  { %v302_v39 = vpop.xlane.xlu1 %301  ;;  %v368_v14 = vsel %vm366_vm2, %v365_v58, %v287_v27  ;;  %v756_v27 = vld [vmem:[#allocation5 + $0x10] sm:$0xff] }
 0x30e   :  { %v370_v57 = vsel %vm369_vm3, %v367_v55, %v302_v39 }
 0x310   :  { %v305_v48 = vpop.xlane.xlu0 %304 }
 0x311   :  { %v371_v61 = vsel %vm369_vm3, %v368_v14, %v305_v48 }
 0x327   :  { %v320_v51 = vpop.xlane.xlu1 %319 }
 0x328   :  { %v373_v59 = vsel %vm372_vm0, %v370_v57, %v320_v51 }
 0x329   :  { %v375_v15 = vmul.f32 0.03125, %v373_v59 }
 0x32a   :  { %v323_v60 = vpop.xlane.xlu0 %322 }
 0x32b   :  { %v374_v16 = vsel %vm372_vm0, %v371_v61, %v323_v60 }
 0x32c   :  { %v376_v63 = vmul.f32 0.03125, %v374_v16 }
 0x345   :  { %v410_v17 = vpop.permute.xlu1 %409 }
 0x346   :  { %v416_v62 = vsel %vm415_vm4, %v375_v15, %v410_v17 }
 0x347   :  { %1039 = vmatpush3.msra.mxu0 %v416_v62  ;;  %v1168_v62 = vmov 1966171168  }
 0x348   :  { %v412_v20 = vpop.permute.xlu0 %411  ;;  %1041 = vmatmul.mubr.msk.f32.vlgmr.msra.gmra.mrb[0].mxu0 %vm351_vm11, %v418_v18  ;;  %1048 = vmatprep.subr.mxu0 %v1164_v38 }
 0x349   :  { %v417_v2 = vsel %vm415_vm4, %v376_v63, %v412_v20  ;;  %1050 = vmatprep.mubr.msk.f32.mxu0 %vm1165_vm15, %v1164_v38  ;;  %v917_v63 = vunpack.c.l.s4 %v1168_v62  ;;  %v919_v20 = vlaneseq }
 0x34a   :  { %1044 = vmatpush3.msra.mxu1 %v417_v2 }
 0x34b   :  { %1046 = vmatmul.mubr.msk.f32.vlgmr.msra.gmra.mrb[0].mxu1 %vm351_vm11, %v418_v18  ;;  %1053 = vmatprep.subr.mxu1 %v1164_v38  ;;  %v918_v2 = vunpack.c.0.s8 %v917_v63 }
 0x34c   :  { %1055 = vmatprep.mubr.msk.f32.mxu1 %vm1165_vm15, %v1164_v38 }
 0x41b   :  { %v489_v3 = vpop.f32.mrb[0].mxu0 }
 0x41c   :  { %v563_v10 = vmax.f32 %v489_v3, 0.0  ;;  %v1042_v36 = vpop.f32.mrb[1].mxu0  ;;  %v920_v3 = vshrl.u32 %v919_v20, 7 }
 0x41e   :  { %v559_v37 = vpop.f32.mrb[0].mxu1  ;;  %1049 = vmatpush3.msk.msra.mxu0 %vm568_vm5, %v563_v10  ;;  %v952_v19 = vsub.s32 1, %v920_v3  ;;  %v960_v22 = vsub.s32 3, %v920_v3 }
 0x41f   :  { %v564_v44 = vmax.f32 %v559_v37, 0.0  ;;  %v1047_v12 = vpop.f32.mrb[1].mxu1  ;;  %1051 = vmatmul.mubr.msk.f32.vlgmr.msra.gmra.mrb[2].mxu0 %vm339_vm7, %v419_v11  ;;  %1059 = vmatprep.subr.bf16.mxu0 %v1058_v7  ;;  %v956_v7 = vsub.s32 2, %v920_v3 }
 0x420   :  { %832 = vmatprep.mubr.f32.mxu0 %v1164_v38  ;;  %1061 = vmatpush1.bf16.msra.mxu0 %v1060_v26 }
 0x421   :  { %1054 = vmatpush3.msk.msra.mxu1 %vm568_vm5, %v564_v44 }
 0x422   :  { %1056 = vmatmul.mubr.msk.f32.vlgmr.msra.gmra.mrb[2].mxu1 %vm339_vm7, %v419_v11  ;;  %1063 = vmatprep.subr.bf16.mxu1 %v1062_v25  ;;  %v921_v11 = vsub.s32 %v918_v2, %v920_v3 }
 0x423   :  { %903 = vmatprep.mubr.f32.mxu1 %v1164_v38  ;;  %v1064_v38 = vpack.c.bf16 %v760_v28, %v756_v27 }
 0x425   :  { %1065 = vmatpush1.bf16.msra.mxu1 %v1064_v38 }
 0x4f2   :  { %v638_v45 = vpop.f32.mrb[2].mxu0 }
 0x4f3   :  { %717 = vrot.lane.b32.xlu1 %v638_v45, %s1167_s19  ;;  %v1052_v52 = vpop.f32.mrb[3].mxu0 }
 0x4f5   :  { %v711_v13 = vpop.f32.mrb[2].mxu1 }
 0x4f6   :  { %v1057_v53 = vpop.f32.mrb[3].mxu1 }
 0x4f7   :  { %719 = vrot.lane.b32.xlu1 %v711_v13, %s1167_s19  ;;  %v948_v53 = vsub.s32 0, %v920_v3 }
 0x565   :  { %v718_v29 = vpop.permute.xlu1 %717 }
 0x566   :  { %v723_v30 = vadd.f32 %v718_v29, %v638_v45 }
 0x568   :  { %v1026_v31 = vmul.f32 -1.442695, %v723_v30 }
 0x569   :  { %v720_v32 = vpop.permute.xlu1 %719 }
 0x56a   :  { %1078 = vpow2.f32 %v1026_v31  ;;  %v724_v33 = vadd.f32 %v720_v32, %v711_v13 }
 0x56c   :  { %v1027_v39 = vmul.f32 -1.442695, %v724_v33 }
 0x56e   :  { %1080 = vpow2.f32 %v1027_v39 }
 0x574   :  { %v1079_v40 = vpop.eup %1078 }
 0x575   :  { %v731_v41 = vadd.f32 1.0, %v1079_v40 }
 0x577   :  { %1082 = vrcp.f32 %v731_v41 }
 0x578   :  { %v1081_v42 = vpop.eup %1080 }
 0x579   :  { %v732_v43 = vadd.f32 1.0, %v1081_v42 }
 0x57b   :  { %1084 = vrcp.f32 %v732_v43 }
 0x581   :  { %v1083_v46 = vpop.eup %1082 }
 0x582   :  { %v737_v47 = vsel %vm415_vm4, %v1083_v46, 0.0 }
 0x583   :  { %v738_v48 = vrot.slane %v737_v47, 4 }
 0x585   :  { %v1085_v49 = vpop.eup %1084  ;;  %v739_v50 = vadd.f32 %v738_v48, %v737_v47 }
 0x586   :  { %v744_v51 = vsel %vm415_vm4, %v1085_v49, 0.0 }
 0x587   :  { %v740_v54 = vrot.slane %v739_v50, 2  ;;  %v745_v55 = vrot.slane %v744_v51, 4 }
 0x589   :  { %v741_v56 = vadd.f32 %v740_v54, %v739_v50  ;;  %v746_v57 = vadd.f32 %v745_v55, %v744_v51 }
 0x58b   :  { %v742_v58 = vrot.slane %v741_v56, 1  ;;  %v747_v59 = vrot.slane %v746_v57, 2 }
 0x58d   :  { %v748_v60 = vadd.f32 %v747_v59, %v746_v57  ;;  %v743_v14 = vadd.f32 %v742_v58, %v741_v56 }
 0x58f   :  { %v749_v61 = vrot.slane %v748_v60, 1  ;;  %v752_v16 = vmul.f32 0.125, %v743_v14 }
 0x591   :  { %v750_v15 = vadd.f32 %v749_v61, %v748_v60 }
 0x593   :  { %v753_v17 = vmul.f32 0.125, %v750_v15 }
 0x595   :  { %v765_v18 = vsel %vm764_vm6, %v753_v17, %v752_v16 }
 0x596   :  { %1028 = vmatmul.mubr.msk.f32.vlgmr.msra.gmra.mrb[4].mxu0 %vm415_vm4, %v765_v18  ;;  %1029 = vmatmul.mubr.msk.f32.vlgmr.msra.gmra.mrb[4].mxu1 %vm415_vm4, %v765_v18 }
 0x669   :  { %v834_v10 = vpop.f32.mrb[4].mxu0  ;;  %v905_v36 = vpop.f32.mrb[4].mxu1 }
 0x66a   :  { %v836_v37 = vpop.f32.mrb[5].mxu0  ;;  %v907_v44 = vpop.f32.mrb[5].mxu1 }
 0x66b   :  { %v914_v12 = vcombine.low %v834_v10, %v836_v37  ;;  %v915_v45 = vcombine.low %v905_v36, %v907_v44 }
 0x66d   :  { %v922_v52 = vrot.slane %v914_v12, %v921_v11  ;;  %v929_v13 = vrot.slane %v915_v45, %v921_v11 }
 0x66f   :  { %v930_v6 = vcombine.low %v922_v52, %v929_v13  ;;  %v931_v21 = vcombine.high %v922_v52, %v929_v13 }
 0x671   :  { %v938_v23 = vrot.slane %v930_v6, %v921_v11  ;;  %v945_v24 = vrot.slane %v931_v21, %v921_v11 }
 0x673   :  { %v949_v25 = vrot.slane %v938_v23, %v948_v53  ;;  %v953_v26 = vrot.slane %v938_v23, %v952_v19  ;;  %v957_v27 = vrot.slane %v938_v23, %v956_v7  ;;  %v961_v28 = vrot.slane %v938_v23, %v960_v22 }
 0x674   :  { %v965_v38 = vrot.slane %v945_v24, %v948_v53  ;;  %v969_v29 = vrot.slane %v945_v24, %v952_v19  ;;  %v973_v30 = vrot.slane %v945_v24, %v956_v7  ;;  %v977_v31 = vrot.slane %v945_v24, %v960_v22 }
 0x675   :  { %v986_v32 = vmul.f32 %v949_v25, %v1225_v0  ;;  %v987_v33 = vmul.f32 %v953_v26, %v1253_v8  ;;  %v988_v39 = vmul.f32 %v957_v27, %v1301_v34  ;;  %v989_v40 = vmul.f32 %v961_v28, %v1353_v4 }
 0x676   :  { %v990_v41 = vmul.f32 %v965_v38, %v1231_v1  ;;  %v991_v42 = vmul.f32 %v969_v29, %v1257_v9  ;;  %v992_v43 = vmul.f32 %v973_v30, %v1305_v35  ;;  %v993_v46 = vmul.f32 %v977_v31, %v1357_v5 }
 0x677   :  { %994 = vst [vmem:[#allocation7] sm:$0xff] %v986_v32  ;;  %995 = vst [vmem:[#allocation7 + $0x8] sm:$0xff] %v987_v33 }
 0x678   :  { %996 = vst [vmem:[#allocation7 + $0x10] sm:$0xff] %v988_v39  ;;  %997 = vst [vmem:[#allocation7 + $0x18] sm:$0xff] %v989_v40 }
 0x679   :  { %998 = vst [vmem:[#allocation7 + $0x20] sm:$0xff] %v990_v41  ;;  %999 = vst [vmem:[#allocation7 + $0x28] sm:$0xff] %v991_v42 }
 0x67a   :  { %1000 = vst [vmem:[#allocation7 + $0x30] sm:$0xff] %v992_v43  ;;  %1001 = vst [vmem:[#allocation7 + $0x38] sm:$0xff] %v993_v46 }
 0x67b   :  { %1141 = shalt.err (!%p1138_p6)
}
 0x67c   :  { %s1142_s24 = scalar_lea.hbm %s1567_s4, 1024 }
 0x67d   :  { %p1143_p7 = scmp.ne.s32.totalorder %s1567_s4, %s1142_s24  ;;  %p1146_p8 = scmp.lt.u32.totalorder %s1142_s24, %s1567_s4 }
 0x67f   :  { %p1148_p9 = pnand %p1146_p8, %p1143_p7 }
 0x681   :  { %1151 = shalt.err (!%p1148_p9)
}
 0x682   :  { %1013 = dma.vmem_to_hbm [thread:$0]  %s1008_s20, 1024, %s1567_s4, [#allocation4], %s1159_s25, %s1159_s25, %s1160_s26  }
 0x683   :  { %1156 = dma.done.wait [#allocation4], 1024  }
 0x684   :  { %1157 = vsyncadd [#allocation4], 4294966272 }
 0x685   :  { %1017 = vsyncpa [#allocation3], 1 }
 0x686   :  { %1018 = vsyncpa [#allocation6], 1 }
 0x687   :  { %1019 = vsyncpa [#allocation4], 1 }

</bundles_post_ra>
